<compile_context>
chip_gen: v7x
topology: tpu7x:2x2x1
jax: 0.10.0
libtpu: 0.0.40
codegen_flags: <defaults>
</compile_context>

<pallas_src>
import numpy as np
import jax
import jax.numpy as jnp
from jax.experimental import pallas as pl
from jax.experimental.pallas import tpu as pltpu

NEG_SLOPE = 0.01   # F.leaky_relu default
BN_EPS = 1e-5      # nn.BatchNorm2d default


# ---------------------------------------------------------------------------
# Helpers
# ---------------------------------------------------------------------------
def _round_up(n, m):
    return ((n + m - 1) // m) * m


def _vmem_capacity_bytes():
    try:
        info = pltpu.get_tpu_info()
        cap = int(getattr(info, "vmem_capacity_bytes", 0) or 0)
        if cap > 0:
            return cap
    except Exception:
        pass
    return 64 * 1024 * 1024          # conservative: v7x per-TensorCore VMEM


def _padded_block_bytes(shape, itemsize):
    """VMEM bytes of one buffer of a block after (8,128) tile padding."""
    shape = tuple(int(d) for d in shape)
    if len(shape) < 2:
        shape = (1,) + shape
    lead = 1
    for d in shape[:-2]:
        lead *= d
    return lead * _round_up(shape[-2], 8) * _round_up(shape[-1], 128) * itemsize


def _pick_row_tile(H, W, Cin, Cout, out_itemsize, vmem_limit):
    """Largest row tile whose double-buffered, padding-aware working set fits."""
    wc = W * Cin
    half = W * 2 * Cout
    cols = 2 * half
    lane = lambda n: _round_up(n, 128)
    # Pipelined blocks that do not scale with the row tile (x2 double buffering).
    fixed = 2 * (_padded_block_bytes((1, 8, wc), 4)          # halo rows
                 + 2 * _padded_block_bytes((1, wc), 4)       # scale, shift
                 + 2 * _padded_block_bytes((wc, cols), 2)    # A_cur, A_up (bf16)
                 + _padded_block_bytes((1, cols), 4))        # bias
    # Per input-row cost: double-buffered input + output blocks (2 output rows
    # per input row) plus in-kernel live values (bf16 operands, f32 accumulator).
    per_row = 2 * (lane(wc) * 4 + 2 * lane(half) * out_itemsize)
    per_row += 2 * lane(wc) * 2 + 2 * lane(cols) * 4
    budget = int(vmem_limit) - fixed - (4 << 20)              # compiler-scratch slack
    th = budget // max(per_row, 1)
    return max(8, (th // 8) * 8)


def _sanitize_row_tile(th, H):
    """Row tile must be a multiple of 8 (sublane tiling) or equal to H."""
    th = max(1, min(int(th), H))
    if th < H:
        th = max(8, (th // 8) * 8)
        th = min(th, H)
    return th


# ---------------------------------------------------------------------------
# Phase-packed deconv weights
# ---------------------------------------------------------------------------
def _pack_deconv_weights(weight, W):
    """ConvTranspose2d weight (Cin, Cout, 3, 3) -> two (W*Cin, 2*W*2*Cout) bf16
    matrices mapping one normalized input row (and the row above it) to every
    output value it produces.  Rows are (b', c) with c fastest; columns are
    (pi, b, pj, oc) with oc fastest, p = output phase (stride-2 decomposition):

      y[2a+pi, 2b+pj, oc] =  sum_c x[a,  b  ,c] * W[c,oc,pi,pj]
                           + sum_c x[a,  b-1,c] * W[c,oc,pi,2 ]   (pj == 0)
                           + sum_c x[a-1,b  ,c] * W[c,oc,2 ,pj]   (pi == 0)
                           + sum_c x[a-1,b-1,c] * W[c,oc,2 ,2 ]   (pi == pj == 0)
    """
    Cin, Cout = weight.shape[0], weight.shape[1]
    Wf = weight.astype(jnp.float32)
    eye_same = jnp.eye(W, dtype=jnp.float32)          # [b', b] : b' == b
    eye_prev = jnp.eye(W, k=1, dtype=jnp.float32)     # [b', b] : b' == b - 1

    # Contribution of input row a to output rows 2a+pi      (kh = pi).
    t1 = jnp.einsum('xb,copq->xcpbqo', eye_same, Wf[:, :, 0:2, 0:2])
    t2 = jnp.einsum('xb,cop->xcpbo', eye_prev, Wf[:, :, 0:2, 2])
    t2 = jnp.stack([t2, jnp.zeros_like(t2)], axis=4)          # insert pj axis
    a_cur = (t1 + t2).reshape(W * Cin, 2 * W * 2 * Cout)

    # Contribution of input row a-1 to output rows 2a+pi     (kh = 2 -> pi = 0).
    u1 = jnp.einsum('xb,coq->xcbqo', eye_same, Wf[:, :, 2, 0:2])
    u2 = jnp.einsum('xb,co->xcbo', eye_prev, Wf[:, :, 2, 2])
    u2 = jnp.stack([u2, jnp.zeros_like(u2)], axis=3)          # insert pj axis
    up0 = u1 + u2                                             # (b', c, b, pj, oc)
    a_up = jnp.stack([up0, jnp.zeros_like(up0)], axis=2)      # insert pi axis
    a_up = a_up.reshape(W * Cin, 2 * W * 2 * Cout)
    return a_cur.astype(jnp.bfloat16), a_up.astype(jnp.bfloat16)


# ---------------------------------------------------------------------------
# Main tile kernel: normalize + ConvTranspose2d(3x3, s=2) + bias + leaky_relu
# ---------------------------------------------------------------------------
def _make_deconv_kernel(halo_last, neg_slope):
    def kernel(x_ref, xup_ref, scale_ref, shift_ref, wcur_ref, wup_ref, b_ref,
               o_ref):
        """
        x_ref     : (1, th, W*Cin)            raw input tile (f32), lane-flattened
        xup_ref   : (1, halo_rows, W*Cin)     window whose row `halo_last` is the
                                              row directly above the tile
        scale_ref : (1, W*Cin)                gamma * rsqrt(var+eps), tiled over W
        shift_ref : (1, W*Cin)                beta - mean*scale,      tiled over W
        wcur_ref  : (W*Cin, 2*W*2*Cout) bf16  row-a weights      (cols: pi,b,pj,oc)
        wup_ref   : (W*Cin, 2*W*2*Cout) bf16  row-(a-1) weights
        b_ref     : (1, 2*W*2*Cout)           bias tiled over (pi,b,pj)
        o_ref     : (1, 2*th, W*2*Cout)       output, row = 2a+pi, lane-dense
        """
        _, TH, WC = x_ref.shape
        cols = wcur_ref.shape[-1]
        half = cols // 2

        scale = scale_ref[...]                                    # (1, WC)
        shift = shift_ref[...]                                    # (1, WC)

        # BatchNorm normalize as a single FMA (f32 VPU math).
        xn = x_ref[...].reshape(TH, WC) * scale + shift           # (TH, WC)

        # Row directly above the tile, normalized; zero for the first H-tile.
        not_first = (pl.program_id(1) > 0).astype(jnp.float32)
        up_raw = xup_ref[...].reshape(xup_ref.shape[1], WC)[halo_last:halo_last + 1, :]
        up = (up_raw * scale + shift) * not_first                 # (1, WC)
        if TH > 1:
            x_up = jnp.concatenate([up, xn[:TH - 1, :]], axis=0)  # rows a-1
        else:
            x_up = up

        # Two MXU matmuls: the whole 3x3/stride-2 transposed conv of one input
        # row (both column taps, all 4 output phases) is folded into the weights.
        acc = jnp.dot(xn.astype(jnp.bfloat16), wcur_ref[...],
                      preferred_element_type=jnp.float32)         # (TH, cols)
        acc = acc + jnp.dot(x_up.astype(jnp.bfloat16), wup_ref[...],
                            preferred_element_type=jnp.float32)
        acc = acc + b_ref[...]
        y = jnp.maximum(acc, neg_slope * acc)                     # leaky_relu

        # Columns are (pi, b, pj, oc): splitting pi into sublane rows gives HBM
        # row order 2a+pi with one dense (2*TH, half) store (no masked stores).
        o_ref[...] = y.reshape(1, 2 * TH, half).astype(o_ref.dtype)

    return kernel


# ---------------------------------------------------------------------------
# Wrapper
# ---------------------------------------------------------------------------
def deconv_layer_gen(x_nchw, gamma, beta, weight, bias, *,
                     row_tile=None, out_dtype=jnp.float32, channels_last=False):
    """PyTorch-equivalent forward. x: (N, Cin, H, W); weight: (Cin, Cout, 3, 3).
    Returns crop(leaky_relu(ConvTranspose2d(BatchNorm2d(x)))) of shape
    (N, Cout, 2H, 2W) (or (N, 2H, 2W, Cout) if channels_last=True)."""
    N, Cin, H, W = x_nchw.shape
    Cout = weight.shape[1]
    wc = W * Cin
    half = W * 2 * Cout
    cols = 2 * half

    x32 = x_nchw.astype(jnp.float32)

    # --- BatchNorm batch statistics: plain XLA reduction on the NCHW input
    # (fuses with the layout change, keeps both TensorCores busy, and the
    # centered variance avoids E[x^2]-mean^2 cancellation).
    mean = jnp.mean(x32, axis=(0, 2, 3))
    var = jnp.mean(jnp.square(x32 - mean[None, :, None, None]), axis=(0, 2, 3))
    inv = jax.lax.rsqrt(var + BN_EPS)
    g32 = gamma.astype(jnp.float32)
    scale = g32 * inv
    shift = beta.astype(jnp.float32) - mean * scale
    # TODO(synk): nn.BatchNorm2d running_mean / running_var buffer updates
    # (training-time side effect) are not replicated; only the forward output is.

    # Channel-last, lane-flattened view (N, H, W*Cin): one layout pass in XLA.
    x_flat = jnp.transpose(x32, (0, 2, 3, 1)).reshape(N, H, wc)
    scale_row = jnp.tile(scale, W).reshape(1, wc)
    shift_row = jnp.tile(shift, W).reshape(1, wc)

    a_cur, a_up = _pack_deconv_weights(weight, W)
    bias_big = jnp.tile(bias.astype(jnp.float32), 2 * W * 2).reshape(1, cols)

    # --- generation-aware, padding-aware row-tile / VMEM budget
    out_itemsize = jnp.dtype(out_dtype).itemsize
    vmem_limit = min(int(_vmem_capacity_bytes() * 0.75), 96 * 1024 * 1024)
    if row_tile is None:
        row_tile = _pick_row_tile(H, W, Cin, Cout, out_itemsize, vmem_limit)
    th = _sanitize_row_tile(row_tile, H)
    nh = pl.cdiv(H, th)          # ragged last tile handled by masked edge blocks

    # Halo: an 8-row, block-aligned window of x whose LAST row is row h*th-1
    # (safe (8,128)-shaped block; first tile of each image is masked in-kernel).
    if nh > 1:
        halo_rows = 8
        th8 = th // 8            # th is a multiple of 8 whenever nh > 1
        halo_map = lambda n, h: (n, jnp.maximum(h * th8 - 1, 0), 0)
    else:
        halo_rows = min(8, H)
        halo_map = lambda n, h: (n, 0, 0)

    kernel = _make_deconv_kernel(halo_rows - 1, NEG_SLOPE)

    out = pl.pallas_call(
        kernel,
        out_shape=jax.ShapeDtypeStruct((N, 2 * H, half), out_dtype),
        grid_spec=pltpu.PrefetchScalarGridSpec(
            num_scalar_prefetch=0,
            grid=(N, nh),
            in_specs=[
                pl.BlockSpec((1, th, wc), lambda n, h: (n, h, 0)),   # x tile
                pl.BlockSpec((1, halo_rows, wc), halo_map),          # halo (from x)
                pl.BlockSpec((1, wc), lambda n, h: (0, 0)),          # scale
                pl.BlockSpec((1, wc), lambda n, h: (0, 0)),          # shift
                pl.BlockSpec((wc, cols), lambda n, h: (0, 0)),       # A_cur (bf16)
                pl.BlockSpec((wc, cols), lambda n, h: (0, 0)),       # A_up  (bf16)
                pl.BlockSpec((1, cols), lambda n, h: (0, 0)),        # bias
            ],
            out_specs=pl.BlockSpec((1, 2 * th, half), lambda n, h: (n, h, 0)),
        ),
        compiler_params=pltpu.CompilerParams(
            dimension_semantics=("parallel", "parallel"),
            vmem_limit_bytes=vmem_limit),
    )(x_flat, x_flat, scale_row, shift_row, a_cur, a_up, bias_big)

    # Free reshape (HBM memory order already (n, 2a+pi, 2b+pj, oc)).
    y_nhwc = out.reshape(N, 2 * H, 2 * W, Cout)
    if channels_last:
        return y_nhwc
    return jnp.transpose(y_nhwc, (0, 3, 1, 2))                  # back to NCHW


# ---------------------------------------------------------------------------
# Pure-JAX reference (replicates the PyTorch forward)
# ---------------------------------------------------------------------------
def reference(x, gamma, beta, weight, bias):
    mean = jnp.mean(x, axis=(0, 2, 3), keepdims=True)
    var = jnp.mean((x - mean) ** 2, axis=(0, 2, 3), keepdims=True)
    xn = (x - mean) * jax.lax.rsqrt(var + BN_EPS) * gamma[None, :, None, None] \
         + beta[None, :, None, None]
    y = jax.lax.conv_general_dilated(
        xn, jnp.flip(weight, (2, 3)),
        window_strides=(1, 1), padding=((2, 2), (2, 2)),
        lhs_dilation=(2, 2),
        dimension_numbers=("NCHW", "IOHW", "NCHW"))
    y = y + bias[None, :, None, None]
    y = jnp.where(y >= 0, y, NEG_SLOPE * y)
    return y[:, :, :-1, :-1]                                    # F.pad(0,-1,0,-1)


if __name__ == "__main__":
    N, Cin, Cout, H, W = 2, 4, 8, 16, 16

    key = jax.random.PRNGKey(0)
    k1, k2, k3, k4, k5 = jax.random.split(key, 5)
    x = jax.random.normal(k1, (N, Cin, H, W), jnp.float32)
    weight = 0.1 * jax.random.normal(k2, (Cin, Cout, 3, 3), jnp.float32)  # ConvTranspose2d weight
    bias = 0.1 * jax.random.normal(k3, (Cout,), jnp.float32)
    gamma = 1.0 + 0.1 * jax.random.normal(k4, (Cin,), jnp.float32)        # BN weight
    beta = 0.1 * jax.random.normal(k5, (Cin,), jnp.float32)               # BN bias

    y_ref = jax.block_until_ready(reference(x, gamma, beta, weight, bias))

    # row_tile=8 -> grid (N, 2): exercises pipelined tiling AND the halo path.
    y_kernel = jax.block_until_ready(
        deconv_layer_gen(x, gamma, beta, weight, bias, row_tile=8))
    assert y_kernel.shape == (N, Cout, 2 * H, 2 * W), y_kernel.shape
    np.testing.assert_allclose(np.asarray(y_kernel), np.asarray(y_ref),
                               rtol=2e-2, atol=2e-2)

    # Auto-picked tile (single H-tile per image): exercises the VMEM-budget path.
    y_kernel2 = jax.block_until_ready(
        deconv_layer_gen(x, gamma, beta, weight, bias))
    np.testing.assert_allclose(np.asarray(y_kernel2), np.asarray(y_ref),
                               rtol=2e-2, atol=2e-2)

    print("KERNEL_OK")
</pallas_src>

<mosaic_0001>
module attributes {stable_mosaic.version = 11 : i64} {
  func.func @kernel(%arg0: i32, %arg1: i32, %arg2: memref<1x8x64xf32, #tpu.memory_space<vmem>>, %arg3: memref<1x8x64xf32, #tpu.memory_space<vmem>>, %arg4: memref<1x64xf32, #tpu.memory_space<vmem>>, %arg5: memref<1x64xf32, #tpu.memory_space<vmem>>, %arg6: memref<64x512xbf16, #tpu.memory_space<vmem>>, %arg7: memref<64x512xbf16, #tpu.memory_space<vmem>>, %arg8: memref<1x512xf32, #tpu.memory_space<vmem>>, %arg9: memref<1x16x256xf32, #tpu.memory_space<vmem>>) attributes {dimension_semantics = [#tpu.dimension_semantics<parallel>, #tpu.dimension_semantics<parallel>], iteration_bounds = array<i64: 2, 2>, scalar_prefetch = 0 : i64, scratch_operands = 0 : i64, tpu.core_type = #tpu.core_type<tc>, window_params = [{transform_indices = @transform_0, window_bounds = array<i64: 1, 8, 64>}, {transform_indices = @transform_1, window_bounds = array<i64: 1, 8, 64>}, {pipeline_mode = #tpu.pipeline_mode<synchronous>, transform_indices = @transform_2, window_bounds = array<i64: 1, 64>}, {pipeline_mode = #tpu.pipeline_mode<synchronous>, transform_indices = @transform_3, window_bounds = array<i64: 1, 64>}, {pipeline_mode = #tpu.pipeline_mode<synchronous>, transform_indices = @transform_4, window_bounds = array<i64: 64, 512>}, {pipeline_mode = #tpu.pipeline_mode<synchronous>, transform_indices = @transform_5, window_bounds = array<i64: 64, 512>}, {pipeline_mode = #tpu.pipeline_mode<synchronous>, transform_indices = @transform_6, window_bounds = array<i64: 1, 512>}, {transform_indices = @transform_7, window_bounds = array<i64: 1, 16, 256>}]} {
    %c0 = arith.constant 0 : index
    %c0_0 = arith.constant 0 : index
    %0 = vector.load %arg4[%c0, %c0_0] : memref<1x64xf32, #tpu.memory_space<vmem>>, vector<1x64xf32>
    %c0_1 = arith.constant 0 : index
    %c0_2 = arith.constant 0 : index
    %1 = vector.load %arg5[%c0_1, %c0_2] : memref<1x64xf32, #tpu.memory_space<vmem>>, vector<1x64xf32>
    %c0_3 = arith.constant 0 : index
    %c0_4 = arith.constant 0 : index
    %c0_5 = arith.constant 0 : index
    %2 = vector.load %arg2[%c0_3, %c0_4, %c0_5] : memref<1x8x64xf32, #tpu.memory_space<vmem>>, vector<1x8x64xf32>
    %3 = vector.shape_cast %2 : vector<1x8x64xf32> to vector<8x64xf32>
    %4 = vector.broadcast %0 : vector<1x64xf32> to vector<8x64xf32>
    %5 = arith.mulf %3, %4 : vector<8x64xf32>
    %6 = vector.broadcast %1 : vector<1x64xf32> to vector<8x64xf32>
    %7 = arith.addf %5, %6 : vector<8x64xf32>
    %c0_i32 = arith.constant 0 : i32
    %8 = arith.cmpi sgt, %arg1, %c0_i32 : i32
    %9 = arith.extui %8 : i1 to i32
    %10 = arith.sitofp %9 : i32 to f32
    %c0_6 = arith.constant 0 : index
    %c0_7 = arith.constant 0 : index
    %c0_8 = arith.constant 0 : index
    %11 = vector.load %arg3[%c0_6, %c0_7, %c0_8] : memref<1x8x64xf32, #tpu.memory_space<vmem>>, vector<1x8x64xf32>
    %12 = vector.shape_cast %11 : vector<1x8x64xf32> to vector<8x64xf32>
    %13 = vector.extract_strided_slice %12 {offsets = [7, 0], sizes = [1, 64], strides = [1, 1]} : vector<8x64xf32> to vector<1x64xf32>
    %14 = arith.mulf %13, %0 : vector<1x64xf32>
    %15 = arith.addf %14, %1 : vector<1x64xf32>
    %16 = vector.broadcast %10 : f32 to vector<1x64xf32>
    %17 = arith.mulf %15, %16 : vector<1x64xf32>
    %18 = vector.extract_strided_slice %7 {offsets = [0, 0], sizes = [7, 64], strides = [1, 1]} : vector<8x64xf32> to vector<7x64xf32>
    %19 = tpu.concatenate %17, %18 in 0 : vector<1x64xf32>, vector<7x64xf32> -> vector<8x64xf32>
    %20 = arith.truncf %7 : vector<8x64xf32> to vector<8x64xbf16>
    %c0_9 = arith.constant 0 : index
    %c0_10 = arith.constant 0 : index
    %21 = vector.load %arg6[%c0_9, %c0_10] : memref<64x512xbf16, #tpu.memory_space<vmem>>, vector<64x512xbf16>
    %cst = arith.constant dense<0.000000e+00> : vector<8x512xf32>
    %22 = tpu.matmul %20, %21, %cst {dimension_numbers = #tpu.dot_dimension_numbers<[1], [0], [0], [1], [0, 0, 1, 1], [], []>} : vector<8x64xbf16>, vector<64x512xbf16>, vector<8x512xf32> -> vector<8x512xf32>
    %23 = arith.truncf %19 : vector<8x64xf32> to vector<8x64xbf16>
    %c0_11 = arith.constant 0 : index
    %c0_12 = arith.constant 0 : index
    %24 = vector.load %arg7[%c0_11, %c0_12] : memref<64x512xbf16, #tpu.memory_space<vmem>>, vector<64x512xbf16>
    %cst_13 = arith.constant dense<0.000000e+00> : vector<8x512xf32>
    %25 = tpu.matmul %23, %24, %cst_13 {dimension_numbers = #tpu.dot_dimension_numbers<[1], [0], [0], [1], [0, 0, 1, 1], [], []>} : vector<8x64xbf16>, vector<64x512xbf16>, vector<8x512xf32> -> vector<8x512xf32>
    %26 = arith.addf %22, %25 : vector<8x512xf32>
    %c0_14 = arith.constant 0 : index
    %c0_15 = arith.constant 0 : index
    %27 = vector.load %arg8[%c0_14, %c0_15] : memref<1x512xf32, #tpu.memory_space<vmem>>, vector<1x512xf32>
    %28 = vector.broadcast %27 : vector<1x512xf32> to vector<8x512xf32>
    %29 = arith.addf %26, %28 : vector<8x512xf32>
    %cst_16 = arith.constant 0.00999999977 : f32
    %30 = vector.broadcast %cst_16 : f32 to vector<8x512xf32>
    %31 = arith.mulf %30, %29 : vector<8x512xf32>
    %32 = arith.maximumf %29, %31 : vector<8x512xf32>
    %33 = vector.shape_cast %32 : vector<8x512xf32> to vector<1x16x256xf32>
    %c0_17 = arith.constant 0 : index
    %c0_18 = arith.constant 0 : index
    %c0_19 = arith.constant 0 : index
    %34 = vector.load %arg9[%c0_17, %c0_18, %c0_19] : memref<1x16x256xf32, #tpu.memory_space<vmem>>, vector<1x16x256xf32>
    tpu.vector_store %arg9[%c0_17, %c0_18, %c0_19], %33 {strides = array<i32>} : memref<1x16x256xf32, #tpu.memory_space<vmem>>, vector<1x16x256xf32>,
    return
  }
  func.func @transform_0(%arg0: i32, %arg1: i32) -> (i32, i32, i32) {
    %c0_i32 = arith.constant 0 : i32
    %c0_i32_0 = arith.constant 0 : i32
    return %arg0, %arg1, %c0_i32 : i32, i32, i32
  }
  func.func @transform_1(%arg0: i32, %arg1: i32) -> (i32, i32, i32) {
    %c1_i32 = arith.constant 1 : i32
    %0 = arith.muli %arg1, %c1_i32 : i32
    %c1_i32_0 = arith.constant 1 : i32
    %1 = arith.subi %0, %c1_i32_0 : i32
    %c0_i32 = arith.constant 0 : i32
    %2 = arith.maxsi %1, %c0_i32 : i32
    %c0_i32_1 = arith.constant 0 : i32
    %c0_i32_2 = arith.constant 0 : i32
    return %arg0, %2, %c0_i32_1 : i32, i32, i32
  }
  func.func @transform_2(%arg0: i32, %arg1: i32) -> (i32, i32) {
    %c0_i32 = arith.constant 0 : i32
    %c0_i32_0 = arith.constant 0 : i32
    %c0_i32_1 = arith.constant 0 : i32
    return %c0_i32, %c0_i32_0 : i32, i32
  }
  func.func @transform_3(%arg0: i32, %arg1: i32) -> (i32, i32) {
    %c0_i32 = arith.constant 0 : i32
    %c0_i32_0 = arith.constant 0 : i32
    %c0_i32_1 = arith.constant 0 : i32
    return %c0_i32, %c0_i32_0 : i32, i32
  }
  func.func @transform_4(%arg0: i32, %arg1: i32) -> (i32, i32) {
    %c0_i32 = arith.constant 0 : i32
    %c0_i32_0 = arith.constant 0 : i32
    %c0_i32_1 = arith.constant 0 : i32
    return %c0_i32, %c0_i32_0 : i32, i32
  }
  func.func @transform_5(%arg0: i32, %arg1: i32) -> (i32, i32) {
    %c0_i32 = arith.constant 0 : i32
    %c0_i32_0 = arith.constant 0 : i32
    %c0_i32_1 = arith.constant 0 : i32
    return %c0_i32, %c0_i32_0 : i32, i32
  }
  func.func @transform_6(%arg0: i32, %arg1: i32) -> (i32, i32) {
    %c0_i32 = arith.constant 0 : i32
    %c0_i32_0 = arith.constant 0 : i32
    %c0_i32_1 = arith.constant 0 : i32
    return %c0_i32, %c0_i32_0 : i32, i32
  }
  func.func @transform_7(%arg0: i32, %arg1: i32) -> (i32, i32, i32) {
    %c0_i32 = arith.constant 0 : i32
    %c0_i32_0 = arith.constant 0 : i32
    return %arg0, %arg1, %c0_i32 : i32, i32, i32
  }
}

</mosaic_0001>

<bundles_post_ra>
// kernel: tpu_custom_call.1
= control target key start
LH: loop header
LB: loop body
LE: loop exit
PB: predicated region body
PF: predicated region fallthrough
CT: control target
= control target key end

     0   :  { %s2020_s0 = inlined_call_operand.hbm [shape: f32[2,16,64], index: 0, kind: input, shape index: {}]   ;;  %s2021_s1 = inlined_call_operand.hbm [shape: f32[2,16,64], index: 1, kind: input, shape index: {}]   ;;  %s2022_s2 = inlined_call_operand.vmem [shape: f32[1,64], index: 2, kind: input, shape index: {}]   ;;  %s2023_s3 = inlined_call_operand.vmem [shape: f32[1,64], index: 3, kind: input, shape index: {}]   ;;  %s2024_s4 = inlined_call_operand.hbm [shape: bf16[64,512], index: 4, kind: input, shape index: {}]   ;;  %s2025_s5 = inlined_call_operand.hbm [shape: bf16[64,512], index: 5, kind: input, shape index: {}]   ;;  %s2026_s6 = inlined_call_operand.vmem [shape: f32[1,512], index: 6, kind: input, shape index: {}]   ;;  %s2027_s7 = inlined_call_operand.hbm [shape: f32[2,32,256], index: 7, kind: output, shape index: {}]  }
   0x1   :  { %2037 = sst [smem:[#allocation20_spill]] %s2023_s3 }
   0x2   :  { %2038 = sst [smem:[#allocation21_spill]] %s2024_s4 }
   0x3   :  { %2039 = sst [smem:[#allocation22_spill]] %s2025_s5 }
   0x4   :  { %2040 = sst [smem:[#allocation23_spill]] %s2026_s6 }
   0x5   :  { %2041 = sst [smem:[#allocation24_spill]] %s2027_s7 }
   0x6   :  { %12 = vsyncpa [#allocation3], 0 }
   0x7   :  { %14 = vsyncpa [#allocation3 + $0x1], 0 }
   0x8   :  { %15 = vsyncpa [#allocation6], 0 }
   0x9   :  { %17 = vsyncpa [#allocation6 + $0x1], 0 }
   0xa   :  { %18 = vsyncpa [#allocation9], 0 }
   0xb   :  { %19 = vsyncpa [#allocation4], 0 }
   0xc   :  { %21 = vsyncpa [#allocation4 + $0x1], 0  ;;  %s1621_s24 = smov 0   ;;  %s1623_s25 = smov 0  }
   0xd   :  { %s1625_s26 = smov 0   ;;  %s1627_s27 = smov 0  }
   0xe   :  { %s1629_s28 = smov 0   ;;  %s1631_s29 = smov 0  }
   0xf   :  { %s1633_s30 = smov 0   ;;  %s1635_s8 = smov 0  }
  0x10   :  { %s1637_s9 = smov 0   ;;  %s1639_s10 = smov 0  }
  0x11   :  { %s1641_s11 = smov 0  }
  0x12 LB: > { %2042 = sst [smem:[#allocation16_spill]] %s1555_s8  ;;  %s1677_s12 = sadd.s32 4294967295, %s1567_s11   ;;  %s1567_s11 = sphi %s1641_s11, %s27_s11   ;;  %s1563_s10 = sphi %s1639_s10, %s2086_s10   ;;  %s1559_s9 = sphi %s1637_s9, %s2085_s9   ;;  %s1555_s8 = sphi %s1635_s8, %s2084_s8   ;;  %s1551_s30 = sphi %s1633_s30, %s2083_s30   ;;  %s1547_s29 = sphi %s1631_s29, %s2082_s29   ;;  %s1543_s28 = sphi %s1629_s28, %s2081_s28   ;;  %s1539_s27 = sphi %s1627_s27, %s2080_s27   ;;  %s1535_s26 = sphi %s1625_s26, %s2079_s26   ;;  %s1531_s25 = sphi %s1623_s25, %s2078_s25   ;;  %s1527_s24 = sphi %s1621_s24, %s2077_s24  }
  0x13   : > { %p1070_p0 = scmp.ge.s32.totalorder %s1567_s11, 1  ;;  %p2029_p1 = scmp.eq.s32.totalorder %s1677_s12, 0 }
  0x14   : > { %p239_p2 = scmp.lt.s32.totalorder %s1567_s11, 5  ;;  %s1569_s14 = smov [#allocation7]  }
  0x15   : > { %s257_s15 = sshll.u32 %s1569_s14, 4  ;;  %s1570_s17 = smov [#allocation8]   ;;  %s258_s15 = int_to_ptr.vmem [resolvable:$true] %s257_s15 }
  0x16   : > { %p1682_p3 = pnand %p1070_p0, %p239_p2  ;;  %s270_s18 = sshll.u32 %s1570_s17, 4  ;;  %s1694_s18 = int_to_ptr.vmem [resolvable:$true] %s270_s18 }
  0x17   : > { %s2045_s4 = sld [smem:[#allocation21_spill]] }
  0x18   : > { %s2043_s13 = scalar_select %p1682_p3, 1, 0 }
  0x19   : > { %p1147_p4 = pneg %p1682_p3 }
  0x1b   : > { %p1690_p5 = pnand %p1147_p4, %p2029_p1 }
  0x1d   : > { %s1316_s21 = scalar_lea.hbm %s2045_s4, 2048  ;;  %p1318_p7 = pneg %p1690_p5 }
  0x1e   : > { %p1317_p6 = scmp.ne.s32.totalorder %s2045_s4, %s1316_s21  ;;  %p1323_p10 = scmp.lt.u32.totalorder %s1316_s21, %s2045_s4 }
  0x20   : > { %p1319_p8 = pnand %p1318_p7, %p1317_p6 }
  0x22   : > { %p1320_p9 = pneg %p1319_p8 }
  0x24   : > { %p1325_p11 = pnand %p1323_p10, %p1320_p9 }
  0x26   : > { %1328 = shalt.err (!%p1325_p11)
}
  0x27   : > { %s1329_s17 = scalar_lea.vmem %s258_s15, 2048  ;;  %p1337_p2 = scmp.lt.s32.totalorder %s258_s15, %s258_s15 }
  0x28   : > { %p1330_p12 = scmp.ne.s32.totalorder %s258_s15, %s1329_s17  ;;  %p1338_p4 = scmp.lt.s32.totalorder %s1329_s17, %s1329_s17 }
  0x2a   : > { %p1332_p13 = pnand %p1330_p12, %p1318_p7  ;;  %p1339_p1 = por %p1338_p4, %p1337_p2 }
  0x2c   : > { %p1333_p0 = pneg %p1332_p13 }
  0x2e   : > { %p1340_p3 = pnand %p1339_p1, %p1333_p0 }
  0x30   : > { %1343 = shalt.err (!%p1340_p3)
}
  0x31   : > { %s1571_s19 = smov 256   ;;  %s1572_s20 = smov 16  }
  0x32   : > { %1150 = dma.hbm_to_vmem [thread:$0]  (!%p1690_p5), %s2045_s4, 2048, %s258_s15, [#allocation6], %s1571_s19, %s1571_s19, %s1572_s20  }
  0x33   : > { %s2046_s5 = sld [smem:[#allocation22_spill]] }
  0x39   : > { %s1344_s14 = scalar_lea.hbm %s2046_s5, 2048 }
  0x3a   : > { %p1345_p6 = scmp.ne.s32.totalorder %s2046_s5, %s1344_s14  ;;  %p1351_p8 = scmp.lt.u32.totalorder %s1344_s14, %s2046_s5 }
  0x3c   : > { %p1347_p1 = pnand %p1345_p6, %p1318_p7 }
  0x3e   : > { %p1348_p3 = pneg %p1347_p1 }
  0x40   : > { %p1353_p9 = pnand %p1351_p8, %p1348_p3 }
  0x42   : > { %1356 = shalt.err (!%p1353_p9)
}
  0x43   : > { %s1357_s15 = scalar_lea.vmem %s1694_s18, 2048  ;;  %p1365_p13 = scmp.lt.s32.totalorder %s1694_s18, %s1694_s18 }
  0x44   : > { %p1358_p10 = scmp.ne.s32.totalorder %s1694_s18, %s1357_s15  ;;  %p1366_p0 = scmp.lt.s32.totalorder %s1357_s15, %s1357_s15 }
  0x46   : > { %p1360_p11 = pnand %p1358_p10, %p1318_p7  ;;  %p1367_p2 = por %p1366_p0, %p1365_p13 }
  0x48   : > { %p1361_p12 = pneg %p1360_p11 }
  0x4a   : > { %p1368_p4 = pnand %p1367_p2, %p1361_p12 }
  0x4c   : > { %1371 = shalt.err (!%p1368_p4)
}
  0x4d   : > { %1153 = dma.hbm_to_vmem [thread:$0]  (!%p1690_p5), %s2046_s5, 2048, %s1694_s18, [#allocation9], %s1571_s19, %s1571_s19, %s1572_s20  }
  0x4e   : > { %s1067_s8 = sadd.s32 4294967294, %s1567_s11   ;;  %s36_s16 = sadd.s32 1, %s1559_s9 }
  0x4f   : > { %p37_p7 = scmp.ge.s32.totalorder %s36_s16, 2  ;;  %s39_s7 = sadd.s32 1, %s1563_s10 }
  0x50   : > { %s48_s21 = sadd.s32 1, %s1547_s29  ;;  %p55_p6 = scmp.ne.s32.totalorder %s1547_s29, %s1543_s28 }
  0x51   : > { %s2088_s16 = smov (%p37_p7, %s36_s16), 0  ;;  %s2090_s7 = smov (!%p37_p7, %s39_s7), %s1563_s10 }
  0x52   : > { %2047 = sst [smem:[#allocation17_spill]] %s2088_s16  ;;  %s44_s22 = ssub.s32 %s1559_s9, %s2088_s16 }
  0x53   : > { %p2034_p1 = scmp.eq.s32.totalorder %s1567_s11, 0  ;;  %p41_p5 = scmp.ge.s32.totalorder %s2090_s7, 2 }
  0x54   : > { %p61_p3 = scmp.ne.s32.totalorder %s1543_s28, %s1539_s27  ;;  %p2050_p9 = scmp.eq.s32.totalorder %s1677_s12, 0 }
  0x55   : > { %p1762_p8 = por %p2034_p1, %p55_p6  ;;  %s2092_s7 = smov (%p41_p5, %s2090_s7), 0 }
  0x56   : > { %2049 = sst [smem:[#allocation18_spill]] %s2092_s7  ;;  %p1770_p10 = por %p2050_p9, %p61_p3 }
  0x57   : > { %s1776_s20 = ssub.s32 %s1563_s10, %s2092_s7  ;;  %p226_p12 = scmp.eq.s32.totalorder %s1677_s12, 3 }
  0x58   : > { %s45_s23 = sor.u32 %s44_s22, %s1776_s20  ;;  %p232_p0 = scmp.eq.s32.totalorder %s1067_s8, 3 }
  0x59   : > { %p46_p11 = scmp.eq.s32.totalorder %s45_s23, 0  ;;  %p1786_p13 = por %p226_p12, %p55_p6 }
  0x5a   : > { %p2033_p2 = scmp.lt.s32.totalorder %s1567_s11, 4  ;;  %p1791_p4 = por %p232_p0, %p61_p3 }
  0x5b   : > { %s1781_s14 = scalar_select %p46_p11, %s1547_s29, %s48_s21  }
  0x5c   : > { %s2053_s17 = scalar_select %p1786_p13, 1, 0 }
  0x5d   : > { %2052 = sst [smem:[#allocation19_spill]] %s1781_s14  ;;  %s287_s3 = sand.u32 1, %s1547_s29  }
  0x5e   : > { %s2054_s15 = scalar_select %p1791_p4, 1, 0 }
  0x5f   : > { %s1074_s6 = sshll.u32 %s287_s3, 3  ;;  %s1075_s22 = sshll.u32 %s1563_s10, 1 }
  0x60   : > { %s296_s23 = sadd.s32 %s1559_s9, %s1075_s22  ;;  %s291_s4 = scalar_lea.vmem [#allocation2], %s1074_s6 }
  0x61   : > { %s300_s5 = sshll.u32 %s291_s4, 4  ;;  %s1076_s21 = sshll.u32 %s296_s23, 7  ;;  %s1799_s5 = int_to_ptr.vmem [resolvable:$true] %s300_s5 }
  0x62   : > { %s1804_s14 = scalar_lea.hbm %s2020_s0, %s1076_s21  ;;  %p1810_p6 = pnand %p2033_p2, %p1762_p8 }
  0x63   : > { %s288_s4 = scalar_lea.sflag [#allocation3], %s287_s3  ;;  %s1372_s6 = scalar_lea.hbm %s1804_s14, 128 }
  0x64   : > { %p1373_p5 = scmp.ne.s32.totalorder %s1804_s14, %s1372_s6  ;;  %p1374_p3 = pneg %p1810_p6 }
  0x65   : > { %s1377_s18 = scalar_lea.hbm %s2020_s0, 512  ;;  %p1378_p8 = scmp.lt.u32.totalorder %s1804_s14, %s2020_s0 }
  0x66   : > { %p1375_p9 = pnand %p1374_p3, %p1373_p5  ;;  %p1379_p12 = scmp.lt.u32.totalorder %s1377_s18, %s1372_s6 }
  0x67   : > { %p1381_p2 = scmp.lt.u32.totalorder %s1372_s6, %s1804_s14 }
  0x68   : > { %p1376_p11 = pneg %p1375_p9  ;;  %p1380_p0 = por %p1379_p12, %p1378_p8 }
  0x6a   : > { %p1382_p1 = por %p1381_p2, %p1380_p0 }
  0x6c   : > { %p1383_p7 = pnand %p1382_p1, %p1376_p11 }
  0x6e   : > { %1386 = shalt.err (!%p1383_p7)
}
  0x6f   : > { %s1387_s3 = scalar_lea.vmem %s1799_s5, 128  ;;  %s1573_s21 = smov [#allocation2]  }
  0x70   : > { %p1388_p5 = scmp.ne.s32.totalorder %s1799_s5, %s1387_s3  ;;  %s1392_s16 = sshll.u32 %s1573_s21, 4  ;;  %s1393_s16 = int_to_ptr.vmem [resolvable:$false] %s1392_s16 }
  0x71   : > { %s1394_s7 = scalar_lea.vmem %s1393_s16, 256  ;;  %p1395_p13 = scmp.lt.s32.totalorder %s1799_s5, %s1393_s16 }
  0x72   : > { %p1390_p9 = pnand %p1388_p5, %p1374_p3  ;;  %p1396_p8 = scmp.lt.s32.totalorder %s1394_s7, %s1387_s3 }
  0x74   : > { %p1391_p4 = pneg %p1390_p9  ;;  %p1397_p12 = por %p1396_p8, %p1395_p13 }
  0x76   : > { %p1398_p2 = pnand %p1397_p12, %p1391_p4 }
  0x78   : > { %1401 = shalt.err (!%p1398_p2)
}
  0x79   : > { %1157 = dma.hbm_to_vmem [thread:$0]  (!%p1810_p6), %s1804_s14, 128, %s1799_s5, %s288_s4  }
  0x7a   : > { %s82_s6 = sadd.s32 1, %s1535_s26  ;;  %p89_p1 = scmp.ne.s32.totalorder %s1535_s26, %s1531_s25 }
  0x7b   : > { %p2056_p13 = scmp.eq.s32.totalorder %s1776_s20, 0  ;;  %p2057_p4 = scmp.eq.s32.totalorder %s1567_s11, 0 }
  0x7c   : > { %p95_p3 = scmp.ne.s32.totalorder %s1531_s25, %s1527_s24  ;;  %s307_s18 = sand.u32 1, %s1567_s11  }
  0x7d   : > { %s1845_s8 = scalar_select %p2056_p13, %s1535_s26, %s82_s6  }
  0x7e   : > { %p91_p7 = por %p89_p1, %p2057_p4  ;;  %s309_s22 = sand.u32 1, %s1535_s26  }
  0x7f   : > { %p2058_p11 = scmp.eq.s32.totalorder %s1677_s12, 0  ;;  %s1077_s3 = sshll.u32 %s309_s22, 3 }
  0x80   : > { %s1524_s21 = sshll.u32 %s1563_s10, 8  ;;  %s311_s20 = scalar_lea.vmem [#allocation5], %s1077_s3 }
  0x81   : > { %p1855_p0 = por %p95_p3, %p2058_p11  ;;  %s1863_s5 = scalar_lea.hbm %s2021_s1, %s1524_s21 }
  0x82   : > { %s323_s24 = sshll.u32 %s311_s20, 4  ;;  %p2060_p6 = scmp.lt.s32.totalorder %s1567_s11, 4  ;;  %s1871_s24 = int_to_ptr.vmem [resolvable:$true] %s323_s24 }
  0x83   : > { %s2059_s23 = scalar_select %p1855_p0, 1, 0 }
  0x84   : > { %p1867_p5 = pnand %p2060_p6, %p91_p7  ;;  %s308_s4 = scalar_lea.sflag [#allocation6], %s307_s18 }
  0x85   : > { %s1402_s6 = scalar_lea.hbm %s1863_s5, 128  ;;  %s1407_s21 = scalar_lea.hbm %s2021_s1, 512 }
  0x86   : > { %p1403_p9 = scmp.ne.s32.totalorder %s1863_s5, %s1402_s6  ;;  %p1404_p8 = pneg %p1867_p5 }
  0x87   : > { %p1408_p1 = scmp.lt.u32.totalorder %s1863_s5, %s2021_s1  ;;  %p1409_p13 = scmp.lt.u32.totalorder %s1407_s21, %s1402_s6 }
  0x88   : > { %p1405_p12 = pnand %p1404_p8, %p1403_p9  ;;  %p1411_p7 = scmp.lt.u32.totalorder %s1402_s6, %s1863_s5 }
  0x89   : > { %p1410_p4 = por %p1409_p13, %p1408_p1 }
  0x8a   : > { %p1406_p2 = pneg %p1405_p12 }
  0x8b   : > { %p1412_p3 = por %p1411_p7, %p1410_p4 }
  0x8d   : > { %p1413_p11 = pnand %p1412_p3, %p1406_p2 }
  0x8f   : > { %1416 = shalt.err (!%p1413_p11)
}
  0x90   : > { %s1417_s18 = scalar_lea.vmem %s1871_s24, 128  ;;  %s1574_s20 = smov [#allocation5]  }
  0x91   : > { %p1418_p6 = scmp.ne.s32.totalorder %s1871_s24, %s1417_s18  ;;  %s1422_s22 = sshll.u32 %s1574_s20, 4  ;;  %s1423_s22 = int_to_ptr.vmem [resolvable:$false] %s1422_s22 }
  0x92   : > { %s1424_s3 = scalar_lea.vmem %s1423_s22, 256  ;;  %p1425_p0 = scmp.lt.s32.totalorder %s1871_s24, %s1423_s22 }
  0x93   : > { %p1420_p9 = pnand %p1418_p6, %p1404_p8  ;;  %p1426_p1 = scmp.lt.s32.totalorder %s1424_s3, %s1417_s18 }
  0x95   : > { %p1421_p12 = pneg %p1420_p9  ;;  %p1427_p13 = por %p1426_p1, %p1425_p0 }
  0x97   : > { %p1428_p4 = pnand %p1427_p13, %p1421_p12 }
  0x99   : > { %1431 = shalt.err (!%p1428_p4)
}
  0x9a   : > { %1160 = dma.hbm_to_vmem [thread:$0]  (!%p1867_p5), %s1863_s5, 128, %s1871_s24, %s308_s4  }
  0x9b   : > { %p2062_p2 = scmp.ne.s32.totalorder %s2043_s13, 0 }
  0x9c   : > { %s1901_s6 = sand.u32 (!%p2062_p2), 1, %s1543_s28  }
  0x9d   : > { %332 = sbr.rel (%p2062_p2) target bundleno = 461 (0x1cd), region = 48  ;;  %s1082_s21 = sshll.u32 (!%p2062_p2), %s1901_s6, 3 }
  0x9e   : > { %s335_s16 = scalar_lea.sflag (!%p2062_p2), [#allocation3], %s1901_s6  ;;  %s1905_s7 = scalar_lea.vmem (!%p2062_p2), [#allocation2], %s1082_s21 }
  0xa4   : > { %1505 = dma.done.wait (%p1770_p10), %s335_s16, 128  }
  0xa5   : > { %1507 = vsyncadd (%p1770_p10), %s335_s16, 4294967168  ;;  %s343_s13 = sand.u32 1, %s1677_s12   ;;  %s345_s5 = sand.u32 1, %s1531_s25  }
  0xa6   : > { %s1913_s24 = sshll.u32 %s345_s5, 3  ;;  %s344_s14 = scalar_lea.sflag [#allocation6], %s343_s13 }
  0xa7   : > { %s347_s4 = scalar_lea.vmem [#allocation5], %s1913_s24  ;;  %p2063_p0 = scmp.ne.s32.totalorder %s2059_s23, 0 }
  0xa9   : > { %1509 = dma.done.wait (%p2063_p0), %s344_s14, 128  }
  0xaa   : > { %1511 = vsyncadd (%p2063_p0), %s344_s14, 4294967168  ;;  %p2064_p5 = scmp.eq.s32.totalorder %s1677_s12, 0 }
  0xac   : > { %1513 = dma.done.wait (%p2064_p5), [#allocation6], 2048   ;;  %p2065_p10 = pmov %p2064_p5 }
  0xad   : > { %p2066_p8 = pmov %p2064_p5 }
  0xae   : > { %1515 = vsyncadd (%p2065_p10), [#allocation6], 4294965248 }
  0xaf   : > { %1517 = dma.done.wait (%p2066_p8), [#allocation9], 2048   ;;  %p2067_p7 = pmov %p2064_p5 }
  0xb0   : > { %v1575_v0 = vmov 0   ;;  %v1268_v1 = vld [vmem:[#allocation8 + $0x4] ss:$16 sps:$4 sm:$0xff]   ;;  %v1270_v2 = vld [vmem:[#allocation8 + $0xc] ss:$16 sps:$4 sm:$0xff]   ;;  %p413_p3 = scmp.gt.s32.totalorder %s1551_s30, 0  ;;  %v796_v56 = vlaneseq }
  0xb1   : > { %1519 = vsyncadd (%p2067_p7), [#allocation9], 4294965248  ;;  %579 = vmatprep.mubr.bf16.mxu0 %v1575_v0  ;;  %620 = vmatprep.mubr.bf16.mxu1 %v1575_v0  ;;  %v1272_v3 = vld [vmem:[#allocation8] ss:$16 sps:$4 sm:$0xff]   ;;  %v1273_v4 = vld [vmem:[#allocation8 + $0x8] ss:$16 sps:$4 sm:$0xff]  }
  0xb2   : > { %547 = vmatprep.subr.bf16.mxu0 %v1268_v1  ;;  %588 = vmatprep.subr.bf16.mxu1 %v1270_v2  ;;  %v1274_v5 = vld [vmem:[#allocation8 + $0x24] ss:$16 sps:$4 sm:$0xff]   ;;  %v1276_v6 = vld [vmem:[#allocation8 + $0x2c] ss:$16 sps:$4 sm:$0xff]   ;;  %v1278_v7 = vld [vmem:[#allocation8 + $0x20] ss:$16 sps:$4 sm:$0xff]  }
  0xb3   : > { %548 = vmatpush1.bf16.msra.mxu0 %v1272_v3  ;;  %589 = vmatpush1.bf16.msra.mxu1 %v1273_v4  ;;  %v1279_v8 = vld [vmem:[#allocation8 + $0x28] ss:$16 sps:$4 sm:$0xff]   ;;  %s414_s12 = scalar_select %p413_p3, 1, 0  ;;  %v1280_v9 = vld [vmem:[#allocation8 + $0x44] ss:$16 sps:$4 sm:$0xff]  }
  0xb4   : > { %549 = vmatprep.subr.bf16.mxu0 %v1274_v5  ;;  %590 = vmatprep.subr.bf16.mxu1 %v1276_v6  ;;  %v1282_v10 = vld [vmem:[#allocation8 + $0x4c] ss:$16 sps:$4 sm:$0xff]   ;;  %v1284_v11 = vld [vmem:[#allocation8 + $0x40] ss:$16 sps:$4 sm:$0xff]   ;;  %v1285_v12 = vld [vmem:[#allocation8 + $0x48] ss:$16 sps:$4 sm:$0xff]  }
  0xb5   : > { %v1286_v13 = vld [vmem:[#allocation8 + $0x64] ss:$16 sps:$4 sm:$0xff]   ;;  %v1288_v14 = vld [vmem:[#allocation8 + $0x6c] ss:$16 sps:$4 sm:$0xff]   ;;  %s415_s19 = scvt.s32.f32 %s414_s12  ;;  %v1290_v15 = vld [vmem:[#allocation8 + $0x60] ss:$16 sps:$4 sm:$0xff]  }
  0xb6   : > { %v1087_v16 = vld [vmem:[%s2022_s2] ss:$0 sm:$0xff]  ;;  %s2068_s3 = sld [smem:[#allocation20_spill]]  ;;  %v416_v19 = vld [vmem:[%s347_s4] sm:$0xff]  ;;  %vm427_vm0 = vcmask 1040384   ;;  %vm543_vm1 = vcmask 523264  }
  0xb7   : > { %550 = vmatpush1.bf16.msra.mxu0 %v1278_v7  ;;  %591 = vmatpush1.bf16.msra.mxu1 %v1279_v8  ;;  %v398_v18 = vld [vmem:[%s1905_s7] sm:$0xff]  ;;  %v417_v22 = vmul.f32 %v1087_v16, %v416_v19  ;;  %v419_v23 = vstv %s415_s19  ;;  %v797_v57 = vshrl.u32 %v796_v56, 7  ;;  %s2069_s7 = sld [smem:[#allocation23_spill]]  ;;  %v1576_v4 = vmov 1983009808   ;;  %s2070_s13 = sld [smem:[#allocation16_spill]] }
  0xb8   : > { %551 = vmatprep.subr.bf16.mxu0 %v1280_v9  ;;  %592 = vmatprep.subr.bf16.mxu1 %v1282_v10  ;;  %v1291_v20 = vld [vmem:[#allocation8 + $0x68] ss:$16 sps:$4 sm:$0xff]   ;;  %v405_v21 = vmul.f32 %v1087_v16, %v398_v18  ;;  %v1294_v24 = vld [vmem:[#allocation7 + $0x4] ss:$16 sps:$4 sm:$0xff]   ;;  %v1297_v27 = vld [vmem:[#allocation7 + $0xc] ss:$16 sps:$4 sm:$0xff]   ;;  %v837_v5 = vunpack.c.l.s4 %v1576_v4 }
  0xb9   : > { %v1292_v31 = vld [vmem:[#allocation7] ss:$16 sps:$4 sm:$0xff]   ;;  %v1295_v32 = vld [vmem:[#allocation7 + $0x8] ss:$16 sps:$4 sm:$0xff]   ;;  %v1300_v34 = vld [vmem:[#allocation7 + $0x24] ss:$16 sps:$4 sm:$0xff]  }
  0xba   : > { %v1303_v36 = vld [vmem:[#allocation7 + $0x2c] ss:$16 sps:$4 sm:$0xff]   ;;  %v1298_v37 = vld [vmem:[#allocation7 + $0x20] ss:$16 sps:$4 sm:$0xff]   ;;  %v1301_v38 = vld [vmem:[#allocation7 + $0x28] ss:$16 sps:$4 sm:$0xff]  }
  0xbb   : > { %552 = vmatpush1.bf16.msra.mxu0 %v1284_v11  ;;  %593 = vmatpush1.bf16.msra.mxu1 %v1285_v12  ;;  %v1306_v39 = vld [vmem:[#allocation7 + $0x44] ss:$16 sps:$4 sm:$0xff]   ;;  %v1309_v40 = vld [vmem:[#allocation7 + $0x4c] ss:$16 sps:$4 sm:$0xff]   ;;  %v1304_v41 = vld [vmem:[#allocation7 + $0x40] ss:$16 sps:$4 sm:$0xff]  }
  0xbc   : > { %v1088_v17 = vld [vmem:[%s2068_s3] ss:$0 sm:$0xff]  ;;  %553 = vmatprep.subr.bf16.mxu0 %v1286_v13  ;;  %594 = vmatprep.subr.bf16.mxu1 %v1288_v14  ;;  %v1307_v42 = vld [vmem:[#allocation7 + $0x48] ss:$16 sps:$4 sm:$0xff]   ;;  %v1312_v43 = vld [vmem:[#allocation7 + $0x64] ss:$16 sps:$4 sm:$0xff]  }
  0xbd   : > { %v412_v25 = vadd.f32 %v1088_v17, %v405_v21  ;;  %v418_v26 = vadd.f32 %v1088_v17, %v417_v22  ;;  %v1315_v44 = vld [vmem:[#allocation7 + $0x6c] ss:$16 sps:$4 sm:$0xff]   ;;  %v1310_v45 = vld [vmem:[#allocation7 + $0x60] ss:$16 sps:$4 sm:$0xff]   ;;  %v1313_v46 = vld [vmem:[#allocation7 + $0x68] ss:$16 sps:$4 sm:$0xff]   ;;  %v838_v22 = vunpack.c.0.s8 %v837_v5 }
  0xbe   : > { %v798_v58 = vsub.s32 0, %v797_v57  ;;  %v806_v59 = vsub.s32 2, %v797_v57  ;;  %v794_v60 = vld [vmem:[%s2069_s7] sm:$0xf]  ;;  %v802_v61 = vsub.s32 1, %v797_v57  ;;  %v810_v62 = vsub.s32 3, %v797_v57 }
  0xbf   : > { %554 = vmatpush1.bf16.msra.mxu0 %v1290_v15  ;;  %595 = vmatpush1.bf16.msra.mxu1 %v1291_v20  ;;  %v420_v28 = vmul.f32 %v419_v23, %v418_v26  ;;  %v425_v29 = vrot.slane %v412_v25, 7  ;;  %v429_v47 = vpack.c.bf16 %v412_v25, %v412_v25  ;;  %v1577_v17 = vmov 1935823168   ;;  %s1086_s5 = sshll.u32 %s1901_s6, 5  ;;  %s1132_s24 = sshll.u32 %s1551_s30, 2 }
  0xc0   : > { %712 = vmatprep.subr.bf16.mxu0 %v1294_v24  ;;  %753 = vmatprep.subr.bf16.mxu1 %v1297_v27  ;;  %v799_v63 = vrot.slane %v794_v60, %v798_v58  ;;  %v803_v3 = vrot.slane %v794_v60, %v802_v61  ;;  %v811_v6 = vrot.slane %v794_v60, %v810_v62  ;;  %v873_v18 = vunpack.c.l.s4 %v1577_v17  ;;  %s1128_s14 = sshll.u32 %s2070_s13, 3  ;;  %s390_s19 = scalar_lea.vmem [#allocation10], %s1086_s5 }
  0xc1   : > { %v422_v30 = vrot.slane %v420_v28, 7  ;;  %s930_s4 = sadd.s32 %s1132_s24, %s1128_s14  ;;  %s933_s23 = sshll.u32 %s390_s19, 4  ;;  %s1957_s23 = int_to_ptr.vmem [resolvable:$true] %s933_s23 }
  0xc2   : > { %s1129_s12 = sshll.u32 %s930_s4, 7  ;;  %s2071_s20 = sld [smem:[#allocation24_spill]] }
  0xc3   : > { %v428_v33 = vsel %vm427_vm0, %v422_v30, %v425_v29  ;;  %v874_v30 = vunpack.c.0.s8 %v873_v18  ;;  %s917_s3 = scalar_lea.sflag [#allocation4], %s1901_s6  ;;  %s1432_s21 = scalar_lea.vmem %s1957_s23, 512 }
  0xc4   : > { %v446_v35 = vpack.c.bf16 %v428_v33, %v428_v33  ;;  %p1433_p11 = scmp.ne.s32.totalorder %s1957_s23, %s1432_s21  ;;  %p2072_p6 = scmp.ne.s32.totalorder %s2053_s17, 0 }
  0xc5   : > { %s1578_s16 = smov [#allocation10]  }
  0xc6   : > { %1105 = vmatmul.mubr.msk.bf16.vlgmr.msra.gmra.mrb[0].mxu0 %vm543_vm1, %v446_v35  ;;  %1106 = vmatmul.mubr.msk.bf16.vlgmr.msra.gmra.mrb[0].mxu1 %vm543_vm1, %v446_v35  ;;  %p1434_p9 = pnand %p1433_p11, %p2072_p6  ;;  %s1436_s7 = sshll.u32 %s1578_s16, 4  ;;  %s1437_s7 = int_to_ptr.vmem [resolvable:$false] %s1436_s7 }
  0xc7   : > { %713 = vmatpush1.bf16.msra.mxu0 %v1292_v31  ;;  %754 = vmatpush1.bf16.msra.mxu1 %v1295_v32  ;;  %v841_v32 = vsub.s32 %v838_v22, %v797_v57  ;;  %s1438_s13 = scalar_lea.vmem %s1437_s7, 1024  ;;  %p1439_p1 = scmp.lt.s32.totalorder %s1957_s23, %s1437_s7 }
  0xc8   : > { %714 = vmatprep.subr.bf16.mxu0 %v1300_v34  ;;  %755 = vmatprep.subr.bf16.mxu1 %v1303_v36  ;;  %s1955_s22 = scalar_lea.hbm %s2071_s20, %s1129_s12  ;;  %p1435_p12 = pneg %p1434_p9 }
  0xc9   : > { %744 = vmatprep.mubr.bf16.mxu0 %v1575_v0  ;;  %785 = vmatprep.mubr.bf16.mxu1 %v1575_v0  ;;  %v807_v0 = vrot.slane %v794_v60, %v806_v59  ;;  %p1440_p13 = scmp.lt.s32.totalorder %s1438_s13, %s1432_s21 }
  0xcb   : > { %715 = vmatpush1.bf16.msra.mxu0 %v1298_v37  ;;  %756 = vmatpush1.bf16.msra.mxu1 %v1301_v38  ;;  %v877_v38 = vsub.s32 %v874_v30, %v797_v57  ;;  %p1441_p4 = por %p1440_p13, %p1439_p1 }
  0xcc   : > { %716 = vmatprep.subr.bf16.mxu0 %v1306_v39  ;;  %757 = vmatprep.subr.bf16.mxu1 %v1309_v40 }
  0xcd   : > { %p1442_p2 = pnand %p1441_p4, %p1435_p12 }
  0xcf   : > { %717 = vmatpush1.bf16.msra.mxu0 %v1304_v41  ;;  %758 = vmatpush1.bf16.msra.mxu1 %v1307_v42 }
  0xd0   : > { %718 = vmatprep.subr.bf16.mxu0 %v1312_v43  ;;  %759 = vmatprep.subr.bf16.mxu1 %v1315_v44 }
  0xd3   : > { %719 = vmatpush1.bf16.msra.mxu0 %v1310_v45  ;;  %760 = vmatpush1.bf16.msra.mxu1 %v1313_v46 }
  0xd6   : > { %1123 = vmatmul.mubr.msk.bf16.vlgmr.msra.gmra.mrb[4].mxu0 %vm543_vm1, %v429_v47  ;;  %1124 = vmatmul.mubr.msk.bf16.vlgmr.msra.gmra.mrb[4].mxu1 %vm543_vm1, %v429_v47 }
 0x199   : > { %v581_v48 = vpop.f32.mrb[0].mxu0  ;;  %v622_v49 = vpop.f32.mrb[0].mxu1 }
 0x19a   : > { %v583_v50 = vpop.f32.mrb[1].mxu0  ;;  %v624_v51 = vpop.f32.mrb[1].mxu1 }
 0x19b   : > { %v585_v52 = vpop.f32.mrb[2].mxu0  ;;  %v626_v53 = vpop.f32.mrb[2].mxu1 }
 0x19c   : > { %v586_v54 = vpop.f32.mrb[3].mxu0  ;;  %v627_v55 = vpop.f32.mrb[3].mxu1 }
 0x1a9   : > { %v746_v1 = vpop.f32.mrb[4].mxu0  ;;  %v787_v2 = vpop.f32.mrb[4].mxu1 }
 0x1aa   : > { %v747_v7 = vadd.f32 %v746_v1, %v581_v48  ;;  %v788_v8 = vadd.f32 %v787_v2, %v622_v49  ;;  %v748_v9 = vpop.f32.mrb[5].mxu0  ;;  %v789_v10 = vpop.f32.mrb[5].mxu1 }
 0x1ab   : > { %v749_v11 = vadd.f32 %v748_v9, %v583_v50  ;;  %v790_v12 = vadd.f32 %v789_v10, %v624_v51  ;;  %v750_v13 = vpop.f32.mrb[6].mxu0  ;;  %v791_v14 = vpop.f32.mrb[6].mxu1 }
 0x1ac   : > { %v816_v15 = vadd.f32 %v799_v63, %v747_v7  ;;  %v818_v16 = vadd.f32 %v807_v0, %v788_v8  ;;  %v751_v19 = vpop.f32.mrb[7].mxu0  ;;  %v792_v20 = vpop.f32.mrb[7].mxu1 }
 0x1ad   : > { %v817_v21 = vadd.f32 %v803_v3, %v749_v11  ;;  %v819_v23 = vadd.f32 %v811_v6, %v790_v12 }
 0x1ae   : > { %v820_v24 = vmul.f32 0.01, %v816_v15  ;;  %v822_v25 = vmul.f32 0.01, %v818_v16 }
 0x1af   : > { %v821_v26 = vmul.f32 0.01, %v817_v21  ;;  %v823_v27 = vmul.f32 0.01, %v819_v23 }
 0x1b0   : > { %v824_v28 = vmax.f32 %v816_v15, %v820_v24  ;;  %v826_v29 = vmax.f32 %v818_v16, %v822_v25 }
 0x1b1   : > { %v825_v31 = vmax.f32 %v817_v21, %v821_v26  ;;  %v827_v33 = vmax.f32 %v819_v23, %v823_v27 }
 0x1b3   : > { %v832_v34 = vcombine.low %v824_v28, %v825_v31  ;;  %v833_v35 = vcombine.high %v824_v28, %v825_v31  ;;  %v834_v36 = vcombine.low %v826_v29, %v827_v33  ;;  %v835_v37 = vcombine.high %v826_v29, %v827_v33 }
 0x1b5   : > { %v842_v39 = vrot.slane %v832_v34, %v841_v32  ;;  %v849_v40 = vrot.slane %v833_v35, %v841_v32  ;;  %v856_v41 = vrot.slane %v834_v36, %v841_v32  ;;  %v863_v42 = vrot.slane %v835_v37, %v841_v32 }
 0x1b7   : > { %v864_v43 = vcombine.low %v842_v39, %v856_v41  ;;  %v865_v44 = vcombine.high %v842_v39, %v856_v41  ;;  %v866_v45 = vcombine.low %v849_v40, %v863_v42  ;;  %v867_v46 = vcombine.high %v849_v40, %v863_v42 }
 0x1b9   : > { %v878_v47 = vrot.slane %v864_v43, %v877_v38  ;;  %v885_v48 = vrot.slane %v865_v44, %v877_v38  ;;  %v892_v49 = vrot.slane %v866_v45, %v877_v38  ;;  %v899_v50 = vrot.slane %v867_v46, %v877_v38 }
 0x1bb   : > { %v904_v51 = vcombine.low %v878_v47, %v885_v48  ;;  %v905_v52 = vcombine.high %v878_v47, %v885_v48  ;;  %v906_v53 = vcombine.low %v892_v49, %v899_v50  ;;  %v907_v54 = vcombine.high %v892_v49, %v899_v50 }
 0x1bd   : > { %912 = vst [vmem:[%s390_s19] sm:$0xff] %v904_v51  ;;  %913 = vst [vmem:[%s390_s19 + $0x8] sm:$0xff] %v905_v52 }
 0x1be   : > { %914 = vst [vmem:[%s390_s19 + $0x10] sm:$0xff] %v906_v53  ;;  %915 = vst [vmem:[%s390_s19 + $0x18] sm:$0xff] %v907_v54 }
 0x1bf   : > { %1445 = shalt.err (!%p1442_p2)
}
 0x1c0   : > { %s1446_s5 = scalar_lea.hbm %s1955_s22, 512  ;;  %s1450_s4 = scalar_lea.hbm %s2071_s20, 2048 }
 0x1c1   : > { %p1447_p0 = scmp.ne.s32.totalorder %s1955_s22, %s1446_s5  ;;  %p1451_p8 = scmp.lt.u32.totalorder %s1955_s22, %s2071_s20 }
 0x1c2   : > { %p1452_p7 = scmp.lt.u32.totalorder %s1450_s4, %s1446_s5  ;;  %p1454_p11 = scmp.lt.u32.totalorder %s1446_s5, %s1955_s22 }
 0x1c3   : > { %p1448_p5 = pnand %p1447_p0, %p2072_p6 }
 0x1c4   : > { %p1453_p3 = por %p1452_p7, %p1451_p8 }
 0x1c5   : > { %p1449_p10 = pneg %p1448_p5 }
 0x1c6   : > { %p1455_p9 = por %p1454_p11, %p1453_p3 }
 0x1c8   : > { %p1456_p12 = pnand %p1455_p9, %p1449_p10 }
 0x1ca   : > { %1459 = shalt.err (!%p1456_p12)
}
 0x1cb   : > { %s1579_s30 = smov 256   ;;  %s1580_s18 = smov 16  }
 0x1cc   : > { %1145 = dma.vmem_to_hbm [thread:$0]  (%p2072_p6), %s1957_s23, 512, %s1955_s22, %s917_s3, %s1579_s30, %s1579_s30, %s1580_s18  }
 0x1cd PF: > { %p1170_p1 = scmp.ge.s32.totalorder %s1567_s11, 2  ;;  %s948_s21 = sand.u32 1, %s1539_s27  }
 0x1ce   : > { %p2073_p13 = scmp.ne.s32.totalorder %s2054_s15, 0  ;;  %s949_s16 = scalar_lea.sflag [#allocation4], %s948_s21 }
 0x1d0   : > { %p1162_p4 = pnand %p1170_p1, %p2073_p13 }
 0x1d2   : > { %1521 = dma.done.wait (!%p1162_p4), %s949_s16, 512  }
 0x1d3   : > { %1523 = vsyncadd (!%p1162_p4), %s949_s16, 4294966784  ;;  %s27_s11 = sadd.s32 1, %s1567_s11   ;;  %s2074_s17 = sld [smem:[#allocation19_spill]] }
 0x1d4   : > { %p24_p2 = scmp.ge.s32.totalorder %s27_s11, 6   ;;  %s2075_s6 = sld [smem:[#allocation17_spill]] }
 0x1d5   : > { %s2076_s23 = sld [smem:[#allocation18_spill]]  ;;  %s2077_s24 = smov %s1531_s25 }
 0x1d6   : > { %s2078_s25 = smov %s1535_s26  ;;  %s2079_s26 = smov %s1845_s8 }
 0x1d7   : > { %s2080_s27 = smov %s1543_s28  ;;  %s2081_s28 = smov %s1547_s29 }
 0x1d8   : > { %s2083_s30 = smov %s1559_s9  ;;  %s2084_s8 = smov %s1563_s10 }
 0x1d9   : > { %s2082_s29 = smov %s2074_s17  ;;  %26 = sbr.rel (!%p24_p2) target bundleno = 18 (0x12), region = 114 }
 0x1da   : > { %s2085_s9 = smov %s2075_s6 }
 0x1db   : > { %s2086_s10 = smov %s2076_s23 }
 0x1e0   :  { %954 = vsyncpa [#allocation3], 1 }
 0x1e1   :  { %956 = vsyncpa [#allocation3 + $0x1], 1 }
 0x1e2   :  { %957 = vsyncpa [#allocation6], 1 }
 0x1e3   :  { %959 = vsyncpa [#allocation6 + $0x1], 1 }
 0x1e4   :  { %960 = vsyncpa [#allocation9], 1 }
 0x1e5   :  { %961 = vsyncpa [#allocation4], 1 }
 0x1e6   :  { %963 = vsyncpa [#allocation4 + $0x1], 1 }

</bundles_post_ra>
